<compile_context>
chip_gen: v5e
topology: v5e:2x2
jax: 0.10.0
libtpu: 0.0.40
codegen_flags: <defaults>
</compile_context>

<pallas_src>
import jax
import jax.numpy as jnp
from jax.experimental import pallas as pl
from jax.experimental.pallas import tpu as pltpu

# ---- "conf" (synthetic, deterministic) --------------------------------------
NUM_USERS = 32
NUM_ITEMS = 48
EMBEDDING_DIM = 32
AVG_RATING = 3.5
FM_K = 10


def _fm_kernel(uid_ref, iid_ref, label_ref, utab_ref, itab_ref, rhs_ref,
               fcb_ref, out_ref):
    B = out_ref.shape[0]
    n_users = utab_ref.shape[0]
    n_items = itab_ref.shape[0]
    K = rhs_ref.shape[1] - 2

    # ---- fused embedding gather: one-hot @ table (MXU) -----------------------
    uid = uid_ref[...]                                        # (B, 1) int32
    iid = iid_ref[...]                                        # (B, 1) int32
    u_oh = (jax.lax.broadcasted_iota(jnp.int32, (B, n_users), 1) == uid
            ).astype(jnp.float32)                             # (B, U)
    i_oh = (jax.lax.broadcasted_iota(jnp.int32, (B, n_items), 1) == iid
            ).astype(jnp.float32)                             # (B, I)
    u_emb = jnp.dot(u_oh, utab_ref[...], preferred_element_type=jnp.float32)
    i_emb = jnp.dot(i_oh, itab_ref[...], preferred_element_type=jnp.float32)

    # ---- single folded matmul: [x, x^2] @ [[V, w, 0], [0, 0, v2sum]] ---------
    lhs = jnp.concatenate(
        [u_emb, i_emb, u_emb * u_emb, i_emb * i_emb], axis=1)  # (B, 2D = 128)
    r = jnp.dot(lhs, rhs_ref[...],
                preferred_element_type=jnp.float32)            # (B, K + 2)

    t1 = r[:, :K]                                   # x @ V             (B, K)
    linear = r[:, K:K + 1]                          # x @ fc_w          (B, 1)
    t2_sum = r[:, K + 1:K + 2]                      # sum_k (x^2)(V^2)  (B, 1)

    fm_out = (0.5 * (jnp.sum(t1 * t1, axis=1, keepdims=True) - t2_sum)
              + linear + fcb_ref[0, 0] + AVG_RATING)           # (B, 1)
    # NOTE: the PyTorch forward adds 0*b_users[user] + 0*b_items[item], which
    # is identically zero -> dead bias inputs dropped from the kernel.

    diff = fm_out - label_ref[...]
    sq = diff * diff                                           # per-example MSE

    # ---- lane-dense output slab: lane 0 = pred, lane 1 = rating_loss ---------
    lane = jax.lax.broadcasted_iota(jnp.int32, out_ref.shape, 1)
    slab = jnp.where(lane == 0, fm_out, 0.0)
    slab = jnp.where(lane == 1, sq, slab)
    out_ref[...] = slab


def fm_forward(user, item, label, params):
    """Returns (prediction (B,), obj_loss scalar, rating_loss (B,))."""
    B = user.shape[0]
    V = params["fm_V"].astype(jnp.float32)                 # (D, K)
    fc_w = params["fc_w"].astype(jnp.float32)              # (D, 1)
    D, K = V.shape

    # Fold fc_w and sum_k(V^2) next to V so the kernel needs ONE matmul.
    v2sum = jnp.sum(V * V, axis=1, keepdims=True)          # (D, 1)
    zc = jnp.zeros((D, 1), jnp.float32)
    rhs = jnp.concatenate(
        [jnp.concatenate([V, fc_w, zc], axis=1),                      # x rows
         jnp.concatenate([jnp.zeros((D, K), jnp.float32), zc, v2sum], axis=1)],
        axis=0)                                            # (2D, K + 2) = (128, 12)

    uid = user.astype(jnp.int32)[:, None]                  # (B, 1)
    iid = item.astype(jnp.int32)[:, None]                  # (B, 1)
    lbl = label.astype(jnp.float32)[:, None]               # (B, 1)

    vmem = pl.BlockSpec(memory_space=pltpu.MemorySpace.VMEM)
    smem = pl.BlockSpec(memory_space=pltpu.MemorySpace.SMEM)

    slab = pl.pallas_call(
        _fm_kernel,
        out_shape=jax.ShapeDtypeStruct((B, 128), jnp.float32),
        in_specs=[vmem, vmem, vmem, vmem, vmem, vmem, smem],
        out_specs=vmem,
    )(uid, iid, lbl,
      params["user_emb"].astype(jnp.float32),
      params["item_emb"].astype(jnp.float32),
      rhs,
      params["fc_b"].astype(jnp.float32))

    prediction = slab[:, 0]
    rating_loss = slab[:, 1]
    obj_loss = jnp.mean(rating_loss)
    return prediction, obj_loss, rating_loss


def init_params(key):
    """Deterministic synthetic init mirroring decoder_fm.reinit() shapes."""
    k = jax.random.split(key, 6)
    E, D = EMBEDDING_DIM, 2 * EMBEDDING_DIM
    bound_u = (6.0 / (NUM_USERS + E)) ** 0.5
    bound_i = (6.0 / (NUM_ITEMS + E)) ** 0.5
    return {
        "user_emb": jax.random.uniform(k[0], (NUM_USERS, E), jnp.float32,
                                       -bound_u, bound_u),
        "item_emb": jax.random.uniform(k[1], (NUM_ITEMS, E), jnp.float32,
                                       -bound_i, bound_i),
        # nn.Linear(dim, 1): weight uniform(-0.05, 0.05), bias 0. Stored as (D,1).
        "fc_w": jax.random.uniform(k[2], (D, 1), jnp.float32, -0.05, 0.05),
        "fc_b": jnp.zeros((1, 1), jnp.float32),
        "fm_V": jax.random.uniform(k[3], (D, FM_K), jnp.float32, -0.05, 0.05),
        "b_users": jax.random.uniform(k[4], (NUM_USERS, 1), jnp.float32, 0.0, 0.1),
        "b_items": jax.random.uniform(k[5], (NUM_ITEMS, 1), jnp.float32, 0.0, 0.1),
    }


if __name__ == "__main__":
    params = init_params(jax.random.PRNGKey(0))

    B = 8
    ku, ki, kl = jax.random.split(jax.random.PRNGKey(1), 3)
    user = jax.random.randint(ku, (B,), 0, NUM_USERS)
    item = jax.random.randint(ki, (B,), 0, NUM_ITEMS)
    label = jax.random.uniform(kl, (B,), jnp.float32, 1.0, 5.0)

    pred, obj_loss, rating_loss = jax.jit(fm_forward)(user, item, label, params)
    jax.block_until_ready((pred, obj_loss, rating_loss))

    # sanity check against pure-JAX reference
    x = jnp.concatenate([params["user_emb"][user], params["item_emb"][item]], 1)
    lin = x @ params["fc_w"] + params["fc_b"][0, 0]
    t1 = (x @ params["fm_V"]) ** 2
    t2 = (x ** 2) @ (params["fm_V"] ** 2)
    ref_pred = (0.5 * jnp.sum(t1 - t2, 1, keepdims=True) + lin + AVG_RATING)[:, 0]
    assert jnp.allclose(pred, ref_pred, atol=1e-4), (pred, ref_pred)
    assert jnp.allclose(rating_loss, (ref_pred - label) ** 2, atol=1e-4)
    assert jnp.allclose(obj_loss, jnp.mean((ref_pred - label) ** 2), atol=1e-4)

    print("KERNEL_OK")
</pallas_src>

<mosaic_0001>
module attributes {stable_mosaic.version = 11 : i64} {
  func.func @_fm_kernel(%arg0: memref<8x1xi32, #tpu.memory_space<vmem>>, %arg1: memref<8x1xi32, #tpu.memory_space<vmem>>, %arg2: memref<8x1xf32, #tpu.memory_space<vmem>>, %arg3: memref<32x32xf32, #tpu.memory_space<vmem>>, %arg4: memref<48x32xf32, #tpu.memory_space<vmem>>, %arg5: memref<128x12xf32, #tpu.memory_space<vmem>>, %arg6: memref<1x1xf32, #tpu.memory_space<smem>>, %arg7: memref<8x128xf32, #tpu.memory_space<vmem>>) attributes {dimension_semantics = [], scalar_prefetch = 0 : i64, scratch_operands = 0 : i64, tpu.core_type = #tpu.core_type<tc>} {
    %c0 = arith.constant 0 : index
    %c0_0 = arith.constant 0 : index
    %0 = vector.load %arg0[%c0, %c0_0] : memref<8x1xi32, #tpu.memory_space<vmem>>, vector<8x1xi32>
    %c0_1 = arith.constant 0 : index
    %c0_2 = arith.constant 0 : index
    %1 = vector.load %arg1[%c0_1, %c0_2] : memref<8x1xi32, #tpu.memory_space<vmem>>, vector<8x1xi32>
    %2 = tpu.iota {dimensions = array<i32: 1>} : vector<8x32xi32>
    %3 = vector.broadcast %0 : vector<8x1xi32> to vector<8x32xi32>
    %4 = arith.cmpi eq, %2, %3 : vector<8x32xi32>
    %5 = arith.extui %4 : vector<8x32xi1> to vector<8x32xi32>
    %6 = arith.sitofp %5 : vector<8x32xi32> to vector<8x32xf32>
    %7 = tpu.iota {dimensions = array<i32: 1>} : vector<8x48xi32>
    %8 = vector.broadcast %1 : vector<8x1xi32> to vector<8x48xi32>
    %9 = arith.cmpi eq, %7, %8 : vector<8x48xi32>
    %10 = arith.extui %9 : vector<8x48xi1> to vector<8x48xi32>
    %11 = arith.sitofp %10 : vector<8x48xi32> to vector<8x48xf32>
    %c0_3 = arith.constant 0 : index
    %c0_4 = arith.constant 0 : index
    %12 = vector.load %arg3[%c0_3, %c0_4] : memref<32x32xf32, #tpu.memory_space<vmem>>, vector<32x32xf32>
    %cst = arith.constant dense<0.000000e+00> : vector<8x32xf32>
    %13 = tpu.matmul %6, %12, %cst {dimension_numbers = #tpu.dot_dimension_numbers<[1], [0], [0], [1], [0, 0, 1, 1], [], []>} : vector<8x32xf32>, vector<32x32xf32>, vector<8x32xf32> -> vector<8x32xf32>
    %c0_5 = arith.constant 0 : index
    %c0_6 = arith.constant 0 : index
    %14 = vector.load %arg4[%c0_5, %c0_6] : memref<48x32xf32, #tpu.memory_space<vmem>>, vector<48x32xf32>
    %cst_7 = arith.constant dense<0.000000e+00> : vector<8x32xf32>
    %15 = tpu.matmul %11, %14, %cst_7 {dimension_numbers = #tpu.dot_dimension_numbers<[1], [0], [0], [1], [0, 0, 1, 1], [], []>} : vector<8x48xf32>, vector<48x32xf32>, vector<8x32xf32> -> vector<8x32xf32>
    %16 = arith.mulf %13, %13 : vector<8x32xf32>
    %17 = arith.mulf %15, %15 : vector<8x32xf32>
    %18 = tpu.concatenate %13, %15, %16, %17 in 1 : vector<8x32xf32>, vector<8x32xf32>, vector<8x32xf32>, vector<8x32xf32> -> vector<8x128xf32>
    %c0_8 = arith.constant 0 : index
    %c0_9 = arith.constant 0 : index
    %19 = vector.load %arg5[%c0_8, %c0_9] : memref<128x12xf32, #tpu.memory_space<vmem>>, vector<128x12xf32>
    %cst_10 = arith.constant dense<0.000000e+00> : vector<8x12xf32>
    %20 = tpu.matmul %18, %19, %cst_10 {dimension_numbers = #tpu.dot_dimension_numbers<[1], [0], [0], [1], [0, 0, 1, 1], [], []>} : vector<8x128xf32>, vector<128x12xf32>, vector<8x12xf32> -> vector<8x12xf32>
    %21 = vector.extract_strided_slice %20 {offsets = [0, 0], sizes = [8, 10], strides = [1, 1]} : vector<8x12xf32> to vector<8x10xf32>
    %22 = vector.extract_strided_slice %20 {offsets = [0, 10], sizes = [8, 1], strides = [1, 1]} : vector<8x12xf32> to vector<8x1xf32>
    %23 = vector.extract_strided_slice %20 {offsets = [0, 11], sizes = [8, 1], strides = [1, 1]} : vector<8x12xf32> to vector<8x1xf32>
    %24 = arith.mulf %21, %21 : vector<8x10xf32>
    %cst_11 = arith.constant dense<0.000000e+00> : vector<8xf32>
    %25 = vector.multi_reduction <add>, %24, %cst_11 [1] : vector<8x10xf32> to vector<8xf32>
    %26 = vector.shape_cast %25 : vector<8xf32> to vector<8x1xf32>
    %27 = arith.subf %26, %23 : vector<8x1xf32>
    %cst_12 = arith.constant 5.000000e-01 : f32
    %28 = vector.broadcast %cst_12 : f32 to vector<8x1xf32>
    %29 = arith.mulf %28, %27 : vector<8x1xf32>
    %30 = arith.addf %29, %22 : vector<8x1xf32>
    %c0_13 = arith.constant 0 : index
    %c0_14 = arith.constant 0 : index
    %31 = memref.load %arg6[%c0_13, %c0_14] : memref<1x1xf32, #tpu.memory_space<smem>>
    %32 = vector.broadcast %31 : f32 to vector<8x1xf32>
    %33 = arith.addf %30, %32 : vector<8x1xf32>
    %cst_15 = arith.constant 3.500000e+00 : f32
    %34 = vector.broadcast %cst_15 : f32 to vector<8x1xf32>
    %35 = arith.addf %33, %34 : vector<8x1xf32>
    %c0_16 = arith.constant 0 : index
    %c0_17 = arith.constant 0 : index
    %36 = vector.load %arg2[%c0_16, %c0_17] : memref<8x1xf32, #tpu.memory_space<vmem>>, vector<8x1xf32>
    %37 = arith.subf %35, %36 : vector<8x1xf32>
    %38 = arith.mulf %37, %37 : vector<8x1xf32>
    %39 = tpu.iota {dimensions = array<i32: 1>} : vector<8x128xi32>
    %c0_i32 = arith.constant 0 : i32
    %40 = vector.broadcast %c0_i32 : i32 to vector<8x128xi32>
    %41 = arith.cmpi eq, %39, %40 : vector<8x128xi32>
    %cst_18 = arith.constant 0.000000e+00 : f32
    %42 = vector.shape_cast %35 : vector<8x1xf32> to vector<8x1xf32>
    %43 = vector.broadcast %42 : vector<8x1xf32> to vector<8x128xf32>
    %44 = vector.broadcast %cst_18 : f32 to vector<8x128xf32>
    %45 = arith.select %41, %43, %44 : vector<8x128xi1>, vector<8x128xf32>
    %c1_i32 = arith.constant 1 : i32
    %46 = vector.broadcast %c1_i32 : i32 to vector<8x128xi32>
    %47 = arith.cmpi eq, %39, %46 : vector<8x128xi32>
    %48 = vector.shape_cast %38 : vector<8x1xf32> to vector<8x1xf32>
    %49 = vector.broadcast %48 : vector<8x1xf32> to vector<8x128xf32>
    %50 = arith.select %47, %49, %45 : vector<8x128xi1>, vector<8x128xf32>
    %c0_19 = arith.constant 0 : index
    %c0_20 = arith.constant 0 : index
    %51 = vector.load %arg7[%c0_19, %c0_20] : memref<8x128xf32, #tpu.memory_space<vmem>>, vector<8x128xf32>
    tpu.vector_store %arg7[%c0_19, %c0_20], %50 {strides = array<i32>} : memref<8x128xf32, #tpu.memory_space<vmem>>, vector<8x128xf32>,
    return
  }
}

</mosaic_0001>

<bundles_post_ra>
// kernel: fm_forward.1
= control target key start
LH: loop header
LB: loop body
LE: loop exit
PB: predicated region body
PF: predicated region fallthrough
CT: control target
= control target key end

     0   :  { %v213_v0 = vmov 0   ;;  %v29_v13 = vlaneseq  ;;  %vm47_vm0 = vcmask 261120   ;;  %v214_v16 = vmov 0.0   ;;  %s216_s22 = smov 96   ;;  %s217_s23 = smov 64   ;;  %s362_s0 = inlined_call_operand.vmem [shape: s32[8,1], index: 0, kind: input, shape index: {}]   ;;  %s363_s3 = inlined_call_operand.vmem [shape: f32[32,32], index: 3, kind: input, shape index: {}]   ;;  %s364_s4 = inlined_call_operand.vmem [shape: f32[48,32], index: 4, kind: input, shape index: {}]   ;;  %s365_s1 = inlined_call_operand.vmem [shape: s32[8,1], index: 1, kind: input, shape index: {}]   ;;  %s366_s5 = inlined_call_operand.vmem [shape: f32[128,12], index: 5, kind: input, shape index: {}]   ;;  %s367_s2 = inlined_call_operand.vmem [shape: f32[8,1], index: 2, kind: input, shape index: {}]   ;;  %s368_s6 = inlined_call_operand.<no memory space> [shape: f32[1,1], index: 6, kind: input, shape index: {}]   ;;  %s369_s7 = inlined_call_operand.vmem [shape: f32[8,128], index: 7, kind: output, shape index: {}]  }
   0x1   :  { %210 = vset.pattern.permute.xlu0 %v213_v0  ;;  %v27_v1 = vld [vmem:[%s362_s0] sm:$0xff]  ;;  %v46_v2 = vld [vmem:[%s363_s3 + $0x18] sm:$0xff]  ;;  %v45_v3 = vld [vmem:[%s363_s3 + $0x10] sm:$0xff]  ;;  %vm77_vm2 = vcmask 392192   ;;  %vm116_vm4 = vcmask 523264   ;;  %vm118_vm5 = vcmask 785408   ;;  %v169_v55 = vstv %s368_s6 }
   0x2   :  { %32 = vperm.xlu0 %210, %v27_v1   ;;  %63 = vmatpush.msra.mxu0 %v46_v2  ;;  %v76_v4 = vld [vmem:[%s364_s4 + $0x28] sm:$0xff]  ;;  %v28_v6 = vld [vmem:[%s365_s1] sm:$0xff]  ;;  %v74_v9 = vld [vmem:[%s364_s4 + $0x18] sm:$0xff]  ;;  %v297_v14 = vand.u32 127, %v29_v13  ;;  %s218_s8 = smov 11   ;;  %vm157_vm6 = vcmask 80896  }
   0x3   :  { %v44_v5 = vld [vmem:[%s363_s3 + $0x8] sm:$0xff]  ;;  %91 = vmatpush.msra.mxu1 %v76_v4  ;;  %v43_v7 = vld [vmem:[%s363_s3] sm:$0xff]  ;;  %v73_v10 = vld [vmem:[%s364_s4 + $0x10] sm:$0xff]  ;;  %v220_v50 = vmov 11  }
   0x4   :  { %64 = vmatpush.msra.mxu0 %v45_v3  ;;  %v75_v8 = vld [vmem:[%s364_s4 + $0x20] sm:$0xff]  ;;  %v72_v11 = vld [vmem:[%s364_s4 + $0x8] sm:$0xff]  ;;  %v135_v24 = vld [vmem:[%s366_s5 + $0x78] sm:$0xff]  ;;  %212 = vset.pattern.permute.xlu1 %v220_v50  ;;  %vm179_vm7 = vcmp.eq.s32.totalorder %v297_v14, 0  ;;  %vm186_vm8 = vcmp.eq.s32.totalorder %v297_v14, 1 }
   0x5   :  { %92 = vmatpush.msra.mxu1 %v75_v8  ;;  %v71_v12 = vld [vmem:[%s364_s4] sm:$0xff]  ;;  %s215_s4 = smov 32   ;;  %v134_v25 = vld [vmem:[%s366_s5 + $0x70] sm:$0xff]  ;;  %136 = vmatpush.msra.mxu2 %v135_v24  ;;  %v133_v26 = vld [vmem:[%s366_s5 + $0x68] sm:$0xff] }
   0x6   :  { %65 = vmatpush.msra.mxu0 %v44_v5  ;;  %v132_v27 = vld [vmem:[%s366_s5 + $0x60] sm:$0xff]  ;;  %v131_v28 = vld [vmem:[%s366_s5 + $0x58] sm:$0xff]  ;;  %v130_v29 = vld [vmem:[%s366_s5 + $0x50] sm:$0xff] }
   0x7   :  { %93 = vmatpush.msra.mxu1 %v74_v9  ;;  %137 = vmatpush.msra.mxu2 %v134_v25  ;;  %v129_v30 = vld [vmem:[%s366_s5 + $0x48] sm:$0xff]  ;;  %v128_v31 = vld [vmem:[%s366_s5 + $0x40] sm:$0xff]  ;;  %v127_v32 = vld [vmem:[%s366_s5 + $0x38] sm:$0xff] }
   0x8   :  { %66 = vmatpush.msra.mxu0 %v43_v7  ;;  %v126_v33 = vld [vmem:[%s366_s5 + $0x30] sm:$0xff]  ;;  %v125_v34 = vld [vmem:[%s366_s5 + $0x28] sm:$0xff]  ;;  %v124_v35 = vld [vmem:[%s366_s5 + $0x20] sm:$0xff] }
   0x9   :  { %94 = vmatpush.msra.mxu1 %v73_v10  ;;  %138 = vmatpush.msra.mxu2 %v133_v26  ;;  %v123_v36 = vld [vmem:[%s366_s5 + $0x18] sm:$0xff]  ;;  %v122_v37 = vld [vmem:[%s366_s5 + $0x10] sm:$0xff]  ;;  %v121_v38 = vld [vmem:[%s366_s5 + $0x8] sm:$0xff] }
   0xa   :  { %38 = vperm.xlu0 %210, %v28_v6   ;;  %v120_v39 = vld [vmem:[%s366_s5] sm:$0xff]  ;;  %s219_s5 = smov 1  }
   0xb   :  { %95 = vmatpush.msra.mxu1 %v72_v11  ;;  %139 = vmatpush.msra.mxu2 %v132_v27  ;;  %v172_v46 = vld [vmem:[%s367_s2] sm:$0xff] }
   0xd   :  { %96 = vmatpush.msra.mxu1 %v71_v12  ;;  %140 = vmatpush.msra.mxu2 %v131_v28 }
   0xf   :  { %141 = vmatpush.msra.mxu2 %v130_v29 }
  0x11   :  { %142 = vmatpush.msra.mxu2 %v129_v30 }
  0x12   :  { %211 = vset.pattern.permute.xlu0 %v220_v50 }
  0x13   :  { %143 = vmatpush.msra.mxu2 %v128_v31 }
  0x15   :  { %144 = vmatpush.msra.mxu2 %v127_v32 }
  0x17   :  { %145 = vmatpush.msra.mxu2 %v126_v33 }
  0x19   :  { %146 = vmatpush.msra.mxu2 %v125_v34 }
  0x1b   :  { %147 = vmatpush.msra.mxu2 %v124_v35 }
  0x1d   :  { %148 = vmatpush.msra.mxu2 %v123_v36 }
  0x1f   :  { %149 = vmatpush.msra.mxu2 %v122_v37 }
  0x21   :  { %150 = vmatpush.msra.mxu2 %v121_v38 }
  0x23   :  { %151 = vmatpush.msra.mxu2 %v120_v39 }
  0x74   :  { %v33_v15 = vpop.permute.xlu0 %32 }
  0x75   :  { %vm34_vm1 = vcmp.eq.s32.totalorder %v297_v14, %v33_v15 }
  0x76   :  { %v198_v17 = vsel %vm34_vm1, 1.0, %v214_v16 }
  0x77   :  { %200 = vmatmul.msk.f32.vlgmr.msra.gmra.mxu0 %vm47_vm0, %v198_v17 }
  0x7c   :  { %v39_v18 = vpop.permute.xlu0 %38 }
  0x7d   :  { %vm40_vm3 = vcmp.eq.s32.totalorder %v297_v14, %v39_v18 }
  0x7e   :  { %v199_v19 = vsel %vm40_vm3, 1.0, %v214_v16 }
  0x7f   :  { %201 = vmatmul.msk.f32.vlgmr.msra.gmra.mxu1 %vm77_vm2, %v199_v19 }
  0xf4   :  { %v68_v22 = vpop.f32.mrf.mxu0 }
  0xf5   :  { %v101_v23 = vmul.f32 %v68_v22, %v68_v22 }
  0xfc   :  { %v98_v20 = vpop.f32.mrf.mxu1 }
  0xfd   :  { %v102_v21 = vmul.f32 %v98_v20, %v98_v20  ;;  %104 = vrot.lane.b32.xlu1 %v98_v20, %s215_s4 }
  0xff   :  { %112 = vrot.lane.b32.xlu2 %v102_v21, %s216_s22 }
 0x105   :  { %108 = vrot.lane.b32.xlu1 %v101_v23, %s217_s23 }
 0x10d   :  { %174 = vrot.lane.b32.xlu1 %v172_v46, %s218_s8 }
 0x159   :  { %v113_v43 = vpop.permute.xlu2 %112 }
 0x16f   :  { %v105_v40 = vpop.permute.xlu1 %104 }
 0x170   :  { %v115_v41 = vsel %vm47_vm0, %v68_v22, %v105_v40 }
 0x177   :  { %v109_v42 = vpop.permute.xlu1 %108 }
 0x178   :  { %v117_v44 = vsel %vm116_vm4, %v115_v41, %v109_v42 }
 0x179   :  { %v119_v45 = vsel %vm118_vm5, %v117_v44, %v113_v43 }
 0x17a   :  { %152 = vmatmul.f32.vlgmr.msra.gmra.mxu2 %v119_v45 }
 0x17f   :  { %v175_v58 = vpop.permute.xlu1 %174 }
 0x1fd   :  { %v153_v47 = vpop.f32.mrf.mxu2 }
 0x1fe   :  { %v156_v48 = vmul.f32 %v153_v47, %v153_v47  ;;  %164 = vrot.lane.b32.xlu0 %v153_v47, %s219_s5 }
 0x200   :  { %v158_v49 = vsel %vm157_vm6, %v156_v48, 0.0 }
 0x201   :  { %159 = vadd.xlane.f32.xlu2 %v158_v49 }
 0x270   :  { %v165_v54 = vpop.permute.xlu0 %164 }
 0x274   :  { %v160_v51 = vpop.xlane.xlu2 %159 }
 0x275   :  { %v161_v52 = vsub.f32 %v160_v51, %v153_v47 }
 0x277   :  { %v162_v53 = vmul.f32 0.5, %v161_v52 }
 0x279   :  { %v167_v56 = vadd.f32 %v165_v54, %v162_v53 }
 0x27b   :  { %v170_v57 = vadd.f32 %v169_v55, %v167_v56 }
 0x27d   :  { %v171_v59 = vadd.f32 3.5, %v170_v57 }
 0x27f   :  { %v177_v60 = vsub.f32 %v171_v59, %v175_v58  ;;  %182 = vperm.xlu0 %211, %v171_v59  }
 0x281   :  { %v178_v61 = vmul.f32 %v177_v60, %v177_v60 }
 0x283   :  { %189 = vperm.xlu1 %212, %v178_v61  }
 0x2f1   :  { %v183_v62 = vpop.permute.xlu0 %182 }
 0x2f2   :  { %v185_v63 = vsel %vm179_vm7, %v183_v62, 0.0 }
 0x2f5   :  { %v190_v0 = vpop.permute.xlu1 %189 }
 0x2f6   :  { %v192_v1 = vsel %vm186_vm8, %v190_v0, %v185_v63 }
 0x2f7   :  { %193 = vst [vmem:[%s369_s7] sm:$0xff] %v192_v1 }

</bundles_post_ra>
